<compile_context>
chip_gen: v7x
topology: tpu7x:2x2x1
jax: 0.10.0
libtpu: 0.0.40
codegen_flags: <defaults>
</compile_context>

<pallas_src>
import functools

import jax
import jax.numpy as jnp
from jax.experimental import pallas as pl
from jax.experimental.pallas import tpu as pltpu


def _sq_shape_kernel(x_ref, w_ref, b_ref, o_ref, *, min_e, max_e):
    # (tb, F) @ (F, M*2) -> f32 accumulation on the MXU.
    acc = jnp.dot(x_ref[...], w_ref[...], preferred_element_type=jnp.float32)
    acc = acc + b_ref[...].astype(jnp.float32)          # (1, M*2) broadcast add
    # Exact sigmoid: exp goes to the EUP; the divide is one VPU op per vreg on
    # a memory-bound kernel, so exactness is kept for the 1e-5 check.
    sig = 1.0 / (1.0 + jnp.exp(-acc))
    o_ref[...] = (sig * max_e + min_e).astype(o_ref.dtype)


def _round_up(x: int, m: int) -> int:
    return ((x + m - 1) // m) * m


def _pick_batch_tile(b: int, f: int, out_cols: int, itemsize: int,
                     vmem_budget_bytes: int = 8 << 20) -> int:
    """Pick the batch tile from a VMEM byte budget.

    Accounts for the double-buffered X block (F lane-pads to a multiple of
    128) and the double-buffered, lane-padded output block.  The default
    8 MiB budget keeps the pipeline comfortably under the smallest scoped
    VMEM default (v5e: 16 MiB) while producing MB-scale DMAs
    (e.g. tb = 4096 rows for F = 32, f32).
    """
    lane_f = _round_up(max(f, 1), 128)
    lane_o = _round_up(max(out_cols, 1), 128)
    bytes_per_row = 2 * lane_f * itemsize + 2 * lane_o * itemsize
    tb = vmem_budget_bytes // bytes_per_row
    tb = max(8, (tb // 8) * 8)          # keep a sublane multiple
    return min(b, tb)                   # small B -> single full-extent block


def sq_shape(x, w, b, *, min_e: float = 0.4, max_e: float = 1.1,
             vmem_budget_bytes: int = 8 << 20):
    """Equivalent of SQShape(input_dims, n_primitives).forward(X, ...).shapes.

    x: (B, F) features, w: (F, M*2) weight (transposed vs. torch.nn.Linear
    storage), b: (M*2,) bias.  Returns (B, M*2) in x.dtype.
    """
    B, F = x.shape
    F_w, out_cols = w.shape
    assert F == F_w, (F, F_w)
    assert b.shape == (out_cols,), b.shape

    tb = _pick_batch_tile(B, F, out_cols, x.dtype.itemsize, vmem_budget_bytes)
    grid = (pl.cdiv(B, tb),)            # ragged last block handled by Pallas
    b2d = b.reshape(1, out_cols)

    kernel = functools.partial(_sq_shape_kernel, min_e=min_e, max_e=max_e)

    return pl.pallas_call(
        kernel,
        out_shape=jax.ShapeDtypeStruct((B, out_cols), x.dtype),
        grid_spec=pltpu.PrefetchScalarGridSpec(
            num_scalar_prefetch=0,
            grid=grid,
            in_specs=[
                # X batch tile: the only array that streams from HBM.
                pl.BlockSpec((tb, F), lambda i: (i, 0)),
                # W and bias never change block index -> single-buffered,
                # VMEM-resident for the whole grid.
                pl.BlockSpec((F, out_cols), lambda i: (0, 0),
                             pipeline_mode=pl.Buffered(1)),
                pl.BlockSpec((1, out_cols), lambda i: (0, 0),
                             pipeline_mode=pl.Buffered(1)),
            ],
            out_specs=pl.BlockSpec((tb, out_cols), lambda i: (i, 0)),
        ),
        compiler_params=pltpu.CompilerParams(
            dimension_semantics=("parallel",)),
    )(x, w, b2d)


def _reference(x, w, b, min_e, max_e):
    return jax.nn.sigmoid(x @ w + b) * max_e + min_e


if __name__ == "__main__":
    key = jax.random.PRNGKey(0)
    B, F = 2, 32            # batch, input feature dim
    n_primitives = 8        # -> output shape (B, 16)
    out_cols = n_primitives * 2
    min_e, max_e = 0.4, 1.1

    kx, kw, kb = jax.random.split(key, 3)
    x = jax.random.normal(kx, (B, F), dtype=jnp.float32)
    # Deterministic Linear params (torch default-ish uniform init scale).
    bound = 1.0 / (F ** 0.5)
    w = jax.random.uniform(kw, (F, out_cols), dtype=jnp.float32,
                           minval=-bound, maxval=bound)
    bias = jax.random.uniform(kb, (out_cols,), dtype=jnp.float32,
                              minval=-bound, maxval=bound)

    # Small demo shape (matches module usage: (B, F) features -> (B, M*2)).
    out = sq_shape(x, w, bias, min_e=min_e, max_e=max_e)
    out = jax.block_until_ready(out)
    ref = _reference(x, w, bias, min_e, max_e)
    assert out.shape == (B, out_cols), out.shape
    assert out.dtype == x.dtype, out.dtype
    assert bool(jnp.allclose(out, ref, rtol=1e-5, atol=1e-5)), \
        float(jnp.max(jnp.abs(out - ref)))

    # Exercise the cdiv grid with a ragged last block (still small: 100 x 32)
    # by shrinking the VMEM budget so the batch tile is 32 rows.
    B2 = 100
    x2 = jax.random.normal(jax.random.PRNGKey(1), (B2, F), dtype=jnp.float32)
    out2 = sq_shape(x2, w, bias, min_e=min_e, max_e=max_e,
                    vmem_budget_bytes=64 << 10)
    out2 = jax.block_until_ready(out2)
    ref2 = _reference(x2, w, bias, min_e, max_e)
    assert out2.shape == (B2, out_cols), out2.shape
    assert bool(jnp.allclose(out2, ref2, rtol=1e-5, atol=1e-5)), \
        float(jnp.max(jnp.abs(out2 - ref2)))

    # TODO(synk): PrimitiveParameters.from_existing is container plumbing with
    # no tensor math; this kernel returns the raw (B, M*2) shapes tensor.
    print("KERNEL_OK")
</pallas_src>

<mosaic_0001>
module attributes {stable_mosaic.version = 11 : i64} {
  func.func @_sq_shape_kernel(%arg0: i32, %arg1: memref<2x32xf32, #tpu.memory_space<vmem>>, %arg2: memref<32x16xf32, #tpu.memory_space<vmem>>, %arg3: memref<1x16xf32, #tpu.memory_space<vmem>>, %arg4: memref<2x16xf32, #tpu.memory_space<vmem>>) attributes {dimension_semantics = [#tpu.dimension_semantics<parallel>], iteration_bounds = array<i64: 1>, scalar_prefetch = 0 : i64, scratch_operands = 0 : i64, tpu.core_type = #tpu.core_type<tc>, window_params = [{transform_indices = @transform_0, window_bounds = array<i64: 2, 32>}, {pipeline_mode = #tpu.pipeline_mode<synchronous>, transform_indices = @transform_1, window_bounds = array<i64: 32, 16>}, {pipeline_mode = #tpu.pipeline_mode<synchronous>, transform_indices = @transform_2, window_bounds = array<i64: 1, 16>}, {transform_indices = @transform_3, window_bounds = array<i64: 2, 16>}]} {
    %c0 = arith.constant 0 : index
    %c0_0 = arith.constant 0 : index
    %0 = vector.load %arg1[%c0, %c0_0] : memref<2x32xf32, #tpu.memory_space<vmem>>, vector<2x32xf32>
    %c0_1 = arith.constant 0 : index
    %c0_2 = arith.constant 0 : index
    %1 = vector.load %arg2[%c0_1, %c0_2] : memref<32x16xf32, #tpu.memory_space<vmem>>, vector<32x16xf32>
    %cst = arith.constant dense<0.000000e+00> : vector<2x16xf32>
    %2 = tpu.matmul %0, %1, %cst {dimension_numbers = #tpu.dot_dimension_numbers<[1], [0], [0], [1], [0, 0, 1, 1], [], []>} : vector<2x32xf32>, vector<32x16xf32>, vector<2x16xf32> -> vector<2x16xf32>
    %c0_3 = arith.constant 0 : index
    %c0_4 = arith.constant 0 : index
    %3 = vector.load %arg3[%c0_3, %c0_4] : memref<1x16xf32, #tpu.memory_space<vmem>>, vector<1x16xf32>
    %4 = vector.broadcast %3 : vector<1x16xf32> to vector<2x16xf32>
    %5 = arith.addf %2, %4 : vector<2x16xf32>
    %cst_5 = arith.constant 0.000000e+00 : f32
    %6 = vector.broadcast %cst_5 : f32 to vector<2x16xf32>
    %7 = arith.subf %6, %5 : vector<2x16xf32>
    %8 = math.exp %7 : vector<2x16xf32>
    %cst_6 = arith.constant 1.000000e+00 : f32
    %9 = vector.broadcast %cst_6 : f32 to vector<2x16xf32>
    %10 = arith.addf %9, %8 : vector<2x16xf32>
    %cst_7 = arith.constant 1.000000e+00 : f32
    %11 = vector.broadcast %cst_7 : f32 to vector<2x16xf32>
    %12 = arith.divf %11, %10 : vector<2x16xf32>
    %cst_8 = arith.constant 1.100000e+00 : f32
    %13 = vector.broadcast %cst_8 : f32 to vector<2x16xf32>
    %14 = arith.mulf %12, %13 : vector<2x16xf32>
    %cst_9 = arith.constant 4.000000e-01 : f32
    %15 = vector.broadcast %cst_9 : f32 to vector<2x16xf32>
    %16 = arith.addf %14, %15 : vector<2x16xf32>
    %c0_10 = arith.constant 0 : index
    %c0_11 = arith.constant 0 : index
    %17 = vector.load %arg4[%c0_10, %c0_11] : memref<2x16xf32, #tpu.memory_space<vmem>>, vector<2x16xf32>
    tpu.vector_store %arg4[%c0_10, %c0_11], %16 {strides = array<i32>} : memref<2x16xf32, #tpu.memory_space<vmem>>, vector<2x16xf32>,
    return
  }
  func.func @transform_0(%arg0: i32) -> (i32, i32) {
    %c0_i32 = arith.constant 0 : i32
    %c0_i32_0 = arith.constant 0 : i32
    return %arg0, %c0_i32 : i32, i32
  }
  func.func @transform_1(%arg0: i32) -> (i32, i32) {
    %c0_i32 = arith.constant 0 : i32
    %c0_i32_0 = arith.constant 0 : i32
    %c0_i32_1 = arith.constant 0 : i32
    return %c0_i32, %c0_i32_0 : i32, i32
  }
  func.func @transform_2(%arg0: i32) -> (i32, i32) {
    %c0_i32 = arith.constant 0 : i32
    %c0_i32_0 = arith.constant 0 : i32
    %c0_i32_1 = arith.constant 0 : i32
    return %c0_i32, %c0_i32_0 : i32, i32
  }
  func.func @transform_3(%arg0: i32) -> (i32, i32) {
    %c0_i32 = arith.constant 0 : i32
    %c0_i32_0 = arith.constant 0 : i32
    return %arg0, %c0_i32 : i32, i32
  }
}

</mosaic_0001>

<bundles_post_ra>
// kernel: tpu_custom_call.1
= control target key start
LH: loop header
LB: loop body
LE: loop exit
PB: predicated region body
PF: predicated region fallthrough
CT: control target
= control target key end

     0   :  { %v181_v3 = vmov 0.0|0.0   ;;  %vm182_vm0 = vmmov 0   ;;  %v183_v6 = vmov 0.0   ;;  %s235_s0 = inlined_call_operand.vmem [shape: f32[2,32], index: 0, kind: input, shape index: {}]   ;;  %s236_s1 = inlined_call_operand.vmem [shape: f32[32,16], index: 1, kind: input, shape index: {}]   ;;  %s237_s2 = inlined_call_operand.vmem [shape: f32[1,16], index: 2, kind: input, shape index: {}]   ;;  %s238_s3 = inlined_call_operand.hbm [shape: f32[2,16], index: 3, kind: output, shape index: {}]  }
   0x1   :  { %v16_v0 = vld [vmem:[%s236_s1] sm:$0xff]  ;;  %v17_v1 = vld [vmem:[%s236_s1 + $0x8] sm:$0xff]  ;;  %v18_v2 = vld [vmem:[%s236_s1 + $0x10] sm:$0xff]  ;;  %143 = vmatprep.subr.bf16.mxu0 %v181_v3  ;;  %140 = vmatprep.mubr.msk.f32.mxu0 %vm182_vm0, %v183_v6 }
   0x2   :  { %v144_v4 = vpack.c.bf16 %v17_v1, %v16_v0  ;;  %v19_v5 = vld [vmem:[%s236_s1 + $0x18] sm:$0xff] }
   0x3   :  { %8 = vsyncpa [#allocation3], 0  ;;  %v147_v7 = vpack.c.bf16 %v19_v5, %v18_v2  ;;  %v15_v8 = vld [vmem:[%s235_s0] sm:$0x3]  ;;  %vm27_vm1 = vcmask 261120   ;;  %s184_s1 = smov [#allocation2]  }
   0x4   :  { %145 = vmatpush3.bf16.msra.mxu0 %v144_v4  ;;  %v125_v9 = vld [vmem:[%s237_s2] ss:$0 sm:$0xff]  ;;  %s117_s24 = sshll.u32 %s184_s1, 4  ;;  %vm109_vm2 = vcmask 123904   ;;  %s118_s24 = int_to_ptr.vmem [resolvable:$true] %s117_s24 }
   0x5   :  { %146 = vmatprep.subr.bf16.mxu0 %v181_v3  ;;  %s157_s0 = scalar_lea.vmem %s118_s24, 32  ;;  %p162_p1 = scmp.lt.s32.totalorder %s118_s24, %s118_s24 }
   0x6   :  { %p158_p0 = scmp.ne.s32.totalorder %s118_s24, %s157_s0  ;;  %p163_p2 = scmp.lt.s32.totalorder %s157_s0, %s157_s0 }
   0x8   :  { %148 = vmatpush3.bf16.msra.mxu0 %v147_v7  ;;  %p164_p3 = por %p163_p2, %p162_p1 }
   0xa   :  { %p165_p4 = pnand %p164_p3, %p158_p0 }
   0xb   :  { %141 = vmatmul.mubr.msk.f32.vlgmr.msra.gmra.mrb[0].mxu0 %vm27_vm1, %v15_v8 }
  0xde   :  { %v97_v10 = vpop.f32.mrb[0].mxu0 }
  0xdf   :  { %v98_v11 = vadd.f32 %v125_v9, %v97_v10  ;;  %v142_v12 = vpop.f32.mrb[1].mxu0 }
  0xe1   :  { %v101_v13 = vsub.f32 0.0, %v98_v11 }
  0xe3   :  { %v102_v14 = vmul.f32 1.442695, %v101_v13 }
  0xe5   :  { %153 = vpow2.f32 %v102_v14 }
  0xef   :  { %v154_v15 = vpop.eup %153 }
  0xf0   :  { %v104_v16 = vadd.f32 1.0, %v154_v15 }
  0xf2   :  { %155 = vrcp.f32 %v104_v16 }
  0xfc   :  { %v156_v17 = vpop.eup %155 }
  0xfd   :  { %v107_v18 = vmul.f32 1.1, %v156_v17 }
  0xff   :  { %v108_v19 = vadd.f32 0.4, %v107_v18 }
 0x101   :  { %110 = vst.msk [vmem:[#allocation2] sm:$0x3] %vm109_vm2, %v108_v19 }
 0x102   :  { %168 = shalt.err (!%p165_p4)
}
 0x103   :  { %s169_s26 = scalar_lea.hbm %s238_s3, 32 }
 0x104   :  { %p170_p5 = scmp.ne.s32.totalorder %s238_s3, %s169_s26  ;;  %p173_p6 = scmp.lt.u32.totalorder %s169_s26, %s238_s3 }
 0x106   :  { %p175_p7 = pnand %p173_p6, %p170_p5 }
 0x108   :  { %178 = shalt.err (!%p175_p7)
}
 0x109   :  { %120 = dma.vmem_to_hbm [thread:$0]  %s118_s24, 32, %s238_s3, [#allocation3]  }
 0x10a   :  { %179 = dma.done.wait [#allocation3], 32  }
 0x10b   :  { %180 = vsyncadd [#allocation3], 4294967264 }
 0x10c   :  { %124 = vsyncpa [#allocation3], 1 }

</bundles_post_ra>
